<compile_context>
chip_gen: v7x
topology: tpu7x:2x2x1
jax: 0.10.0
libtpu: 0.0.40
codegen_flags: <defaults>
</compile_context>

<pallas_src>
import jax
import jax.numpy as jnp
from jax import lax
from jax.experimental import pallas as pl
from jax.experimental.pallas import tpu as pltpu

D_in = 23
D_out = 1
HIDDEN = (16, 8, 4)

# Default tile sized against v7x's smaller VMEM; on v5e/v6e (128 MiB VMEM) this
# can be swept up to 2048-4096 rows to shave the per-grid-step overhead.
DEFAULT_TILE_B = 512


def _round_up(n, m):
    return ((n + m - 1) // m) * m


def _mlp_kernel(x_ref, w1_ref, b1_ref, w2_ref, b2_ref, w3_ref, b3_ref,
                w4_ref, b4_ref, o_ref):
    """Fused MLP forward for one batch tile.

    x_ref: (TILE_B, D_in) -- batch on sublanes only at the input.
    Weights are (out, in), biases (out, 1). The first dot contracts the feature
    axis of both operands (== W1 @ x^T), so every activation from h1 onward is
    (features, TILE_B): batch on the lane axis, lane-dense output store.
    """
    # Linear(23, 16) + ReLU   (Dropout -> identity in eval mode)
    h1 = lax.dot_general(
        w1_ref[...], x_ref[...],
        dimension_numbers=(((1,), (1,)), ((), ())),
        preferred_element_type=jnp.float32) + b1_ref[...]          # (16, TILE_B)
    h1 = jnp.maximum(h1, 0.0)

    # Linear(16, 8) + ReLU
    h2 = jnp.dot(w2_ref[...], h1,
                 preferred_element_type=jnp.float32) + b2_ref[...]  # (8, TILE_B)
    h2 = jnp.maximum(h2, 0.0)

    # Linear(8, 4) + ReLU
    h3 = jnp.dot(w3_ref[...], h2,
                 preferred_element_type=jnp.float32) + b3_ref[...]  # (4, TILE_B)
    h3 = jnp.maximum(h3, 0.0)

    # Linear(4, 1)   (Dropout -> identity in eval mode)
    h4 = jnp.dot(w4_ref[...], h3,
                 preferred_element_type=jnp.float32) + b4_ref[...]  # (1, TILE_B)

    # Sigmoid: exact (exp on EUP + precise divide). The kernel is mem-bound, so
    # the approximate EUP reciprocal saved nothing and cost ~1.5e-3 accuracy.
    o_ref[...] = (1.0 / (1.0 + jnp.exp(-h4))).astype(o_ref.dtype)


def jstocks_forward(x, params, tile_b=DEFAULT_TILE_B):
    """x: (B, 23) float32. params: w{i} as (out, in), b{i} as (out, 1). Returns (B, 1)."""
    B = x.shape[0]

    # Tile size must be a multiple of 128 (lane width); shrink for tiny batches.
    tile_b = min(tile_b, _round_up(max(B, 1), 128))
    B_pad = _round_up(B, tile_b)
    if B_pad != B:
        # Padded tail rows produce garbage rows that are sliced off below; the
        # computation is purely per-row so no masking is needed.
        x = jnp.pad(x, ((0, B_pad - B), (0, 0)))

    w1, b1 = params["w1"], params["b1"]
    w2, b2 = params["w2"], params["b2"]
    w3, b3 = params["w3"], params["b3"]
    w4, b4 = params["w4"], params["b4"]

    grid = (B_pad // tile_b,)

    def _resident(shape):
        # Full-extent block, constant index map -> stays in VMEM across the grid.
        return pl.BlockSpec(shape, lambda i: (0, 0))

    in_specs = [
        pl.BlockSpec((tile_b, D_in), lambda i: (i, 0)),   # x: streamed per tile
        _resident(w1.shape), _resident(b1.shape),
        _resident(w2.shape), _resident(b2.shape),
        _resident(w3.shape), _resident(b3.shape),
        _resident(w4.shape), _resident(b4.shape),
    ]
    out_specs = pl.BlockSpec((1, tile_b), lambda i: (0, i))   # lane-dense (1, TILE_B)

    flops_per_row = 2 * (D_in * 16 + 16 * 8 + 8 * 4 + 4 * 1)
    param_bytes = sum(int(v.size) * 4 for v in params.values())
    cost = pl.CostEstimate(
        flops=flops_per_row * B_pad,
        transcendentals=B_pad,                       # one exp per output element
        bytes_accessed=(B_pad * D_in + B_pad) * 4 + param_bytes,
    )

    out = pl.pallas_call(
        _mlp_kernel,
        out_shape=jax.ShapeDtypeStruct((1, B_pad), jnp.float32),
        grid=grid,
        in_specs=in_specs,
        out_specs=out_specs,
        compiler_params=pltpu.CompilerParams(
            dimension_semantics=("parallel",)),       # megacore sharding on v7x
        cost_estimate=cost,
    )(x, w1, b1, w2, b2, w3, b3, w4, b4)

    return out[0, :B].reshape(B, D_out)


def init_params(key):
    """Deterministic init mimicking PyTorch Linear default (U[-1/sqrt(fan_in), +...]).

    Weights stored in PyTorch-native (out_features, in_features) layout,
    biases as (out_features, 1) so they broadcast along the lane (batch) axis.
    """
    dims = [D_in] + list(HIDDEN) + [D_out]
    params = {}
    for i, (fan_in, fan_out) in enumerate(zip(dims[:-1], dims[1:]), start=1):
        key, kw, kb = jax.random.split(key, 3)
        bound = 1.0 / jnp.sqrt(jnp.float32(fan_in))
        params[f"w{i}"] = jax.random.uniform(
            kw, (fan_out, fan_in), jnp.float32, -bound, bound)
        params[f"b{i}"] = jax.random.uniform(
            kb, (fan_out, 1), jnp.float32, -bound, bound)
    return params


def reference_forward(x, params):
    h = x
    for i in range(1, 5):
        h = h @ params[f"w{i}"].T + params[f"b{i}"][:, 0]
        if i < 4:
            h = jnp.maximum(h, 0.0)
    return jax.nn.sigmoid(h)


if __name__ == "__main__":
    key = jax.random.PRNGKey(0)
    kx, kp = jax.random.split(key)

    B = 8
    x = jax.random.normal(kx, (B, D_in), dtype=jnp.float32)
    params = init_params(kp)

    out = jstocks_forward(x, params)
    out = jax.block_until_ready(out)

    ref = reference_forward(x, params)
    assert out.shape == (B, D_out), out.shape
    assert jnp.allclose(out, ref, atol=1e-5, rtol=1e-5), (
        f"max abs err {jnp.max(jnp.abs(out - ref))}")

    print("KERNEL_OK")
</pallas_src>

<mosaic_0001>
module attributes {stable_mosaic.version = 11 : i64} {
  func.func @_mlp_kernel(%arg0: i32, %arg1: memref<128x23xf32, #tpu.memory_space<vmem>>, %arg2: memref<16x23xf32, #tpu.memory_space<vmem>>, %arg3: memref<16x1xf32, #tpu.memory_space<vmem>>, %arg4: memref<8x16xf32, #tpu.memory_space<vmem>>, %arg5: memref<8x1xf32, #tpu.memory_space<vmem>>, %arg6: memref<4x8xf32, #tpu.memory_space<vmem>>, %arg7: memref<4x1xf32, #tpu.memory_space<vmem>>, %arg8: memref<1x4xf32, #tpu.memory_space<vmem>>, %arg9: memref<1x1xf32, #tpu.memory_space<vmem>>, %arg10: memref<1x128xf32, #tpu.memory_space<vmem>>) attributes {dimension_semantics = [#tpu.dimension_semantics<parallel>], iteration_bounds = array<i64: 1>, scalar_prefetch = 0 : i64, scratch_operands = 0 : i64, tpu.core_type = #tpu.core_type<tc>, window_params = [{transform_indices = @transform_0, window_bounds = array<i64: 128, 23>}, {pipeline_mode = #tpu.pipeline_mode<synchronous>, transform_indices = @transform_1, window_bounds = array<i64: 16, 23>}, {pipeline_mode = #tpu.pipeline_mode<synchronous>, transform_indices = @transform_2, window_bounds = array<i64: 16, 1>}, {pipeline_mode = #tpu.pipeline_mode<synchronous>, transform_indices = @transform_3, window_bounds = array<i64: 8, 16>}, {pipeline_mode = #tpu.pipeline_mode<synchronous>, transform_indices = @transform_4, window_bounds = array<i64: 8, 1>}, {pipeline_mode = #tpu.pipeline_mode<synchronous>, transform_indices = @transform_5, window_bounds = array<i64: 4, 8>}, {pipeline_mode = #tpu.pipeline_mode<synchronous>, transform_indices = @transform_6, window_bounds = array<i64: 4, 1>}, {pipeline_mode = #tpu.pipeline_mode<synchronous>, transform_indices = @transform_7, window_bounds = array<i64: 1, 4>}, {pipeline_mode = #tpu.pipeline_mode<synchronous>, transform_indices = @transform_8, window_bounds = array<i64: 1, 1>}, {transform_indices = @transform_9, window_bounds = array<i64: 1, 128>}]} {
    %c0 = arith.constant 0 : index
    %c0_0 = arith.constant 0 : index
    %0 = vector.load %arg2[%c0, %c0_0] : memref<16x23xf32, #tpu.memory_space<vmem>>, vector<16x23xf32>
    %c0_1 = arith.constant 0 : index
    %c0_2 = arith.constant 0 : index
    %1 = vector.load %arg1[%c0_1, %c0_2] : memref<128x23xf32, #tpu.memory_space<vmem>>, vector<128x23xf32>
    %cst = arith.constant dense<0.000000e+00> : vector<16x128xf32>
    %2 = tpu.matmul %0, %1, %cst {dimension_numbers = #tpu.dot_dimension_numbers<[1], [1], [0], [0], [0, 0, 1, 0], [], []>} : vector<16x23xf32>, vector<128x23xf32>, vector<16x128xf32> -> vector<16x128xf32>
    %c0_3 = arith.constant 0 : index
    %c0_4 = arith.constant 0 : index
    %3 = vector.load %arg3[%c0_3, %c0_4] : memref<16x1xf32, #tpu.memory_space<vmem>>, vector<16x1xf32>
    %4 = vector.broadcast %3 : vector<16x1xf32> to vector<16x128xf32>
    %5 = arith.addf %2, %4 : vector<16x128xf32>
    %cst_5 = arith.constant 0.000000e+00 : f32
    %6 = vector.broadcast %cst_5 : f32 to vector<16x128xf32>
    %7 = arith.maximumf %5, %6 : vector<16x128xf32>
    %c0_6 = arith.constant 0 : index
    %c0_7 = arith.constant 0 : index
    %8 = vector.load %arg4[%c0_6, %c0_7] : memref<8x16xf32, #tpu.memory_space<vmem>>, vector<8x16xf32>
    %cst_8 = arith.constant dense<0.000000e+00> : vector<8x128xf32>
    %9 = tpu.matmul %8, %7, %cst_8 {dimension_numbers = #tpu.dot_dimension_numbers<[1], [0], [0], [1], [0, 0, 1, 1], [], []>} : vector<8x16xf32>, vector<16x128xf32>, vector<8x128xf32> -> vector<8x128xf32>
    %c0_9 = arith.constant 0 : index
    %c0_10 = arith.constant 0 : index
    %10 = vector.load %arg5[%c0_9, %c0_10] : memref<8x1xf32, #tpu.memory_space<vmem>>, vector<8x1xf32>
    %11 = vector.broadcast %10 : vector<8x1xf32> to vector<8x128xf32>
    %12 = arith.addf %9, %11 : vector<8x128xf32>
    %cst_11 = arith.constant 0.000000e+00 : f32
    %13 = vector.broadcast %cst_11 : f32 to vector<8x128xf32>
    %14 = arith.maximumf %12, %13 : vector<8x128xf32>
    %c0_12 = arith.constant 0 : index
    %c0_13 = arith.constant 0 : index
    %15 = vector.load %arg6[%c0_12, %c0_13] : memref<4x8xf32, #tpu.memory_space<vmem>>, vector<4x8xf32>
    %cst_14 = arith.constant dense<0.000000e+00> : vector<4x128xf32>
    %16 = tpu.matmul %15, %14, %cst_14 {dimension_numbers = #tpu.dot_dimension_numbers<[1], [0], [0], [1], [0, 0, 1, 1], [], []>} : vector<4x8xf32>, vector<8x128xf32>, vector<4x128xf32> -> vector<4x128xf32>
    %c0_15 = arith.constant 0 : index
    %c0_16 = arith.constant 0 : index
    %17 = vector.load %arg7[%c0_15, %c0_16] : memref<4x1xf32, #tpu.memory_space<vmem>>, vector<4x1xf32>
    %18 = vector.broadcast %17 : vector<4x1xf32> to vector<4x128xf32>
    %19 = arith.addf %16, %18 : vector<4x128xf32>
    %cst_17 = arith.constant 0.000000e+00 : f32
    %20 = vector.broadcast %cst_17 : f32 to vector<4x128xf32>
    %21 = arith.maximumf %19, %20 : vector<4x128xf32>
    %c0_18 = arith.constant 0 : index
    %c0_19 = arith.constant 0 : index
    %22 = vector.load %arg8[%c0_18, %c0_19] : memref<1x4xf32, #tpu.memory_space<vmem>>, vector<1x4xf32>
    %cst_20 = arith.constant dense<0.000000e+00> : vector<1x128xf32>
    %23 = tpu.matmul %22, %21, %cst_20 {dimension_numbers = #tpu.dot_dimension_numbers<[1], [0], [0], [1], [0, 0, 1, 1], [], []>} : vector<1x4xf32>, vector<4x128xf32>, vector<1x128xf32> -> vector<1x128xf32>
    %c0_21 = arith.constant 0 : index
    %c0_22 = arith.constant 0 : index
    %24 = vector.load %arg9[%c0_21, %c0_22] : memref<1x1xf32, #tpu.memory_space<vmem>>, vector<1x1xf32>
    %25 = vector.broadcast %24 : vector<1x1xf32> to vector<1x128xf32>
    %26 = arith.addf %23, %25 : vector<1x128xf32>
    %cst_23 = arith.constant 0.000000e+00 : f32
    %27 = vector.broadcast %cst_23 : f32 to vector<1x128xf32>
    %28 = arith.subf %27, %26 : vector<1x128xf32>
    %29 = math.exp %28 : vector<1x128xf32>
    %cst_24 = arith.constant 1.000000e+00 : f32
    %30 = vector.broadcast %cst_24 : f32 to vector<1x128xf32>
    %31 = arith.addf %30, %29 : vector<1x128xf32>
    %cst_25 = arith.constant 1.000000e+00 : f32
    %32 = vector.broadcast %cst_25 : f32 to vector<1x128xf32>
    %33 = arith.divf %32, %31 : vector<1x128xf32>
    %c0_26 = arith.constant 0 : index
    %c0_27 = arith.constant 0 : index
    %34 = vector.load %arg10[%c0_26, %c0_27] : memref<1x128xf32, #tpu.memory_space<vmem>>, vector<1x128xf32>
    tpu.vector_store %arg10[%c0_26, %c0_27], %33 {strides = array<i32>} : memref<1x128xf32, #tpu.memory_space<vmem>>, vector<1x128xf32>,
    return
  }
  func.func @transform_0(%arg0: i32) -> (i32, i32) {
    %c0_i32 = arith.constant 0 : i32
    %c0_i32_0 = arith.constant 0 : i32
    return %arg0, %c0_i32 : i32, i32
  }
  func.func @transform_1(%arg0: i32) -> (i32, i32) {
    %c0_i32 = arith.constant 0 : i32
    %c0_i32_0 = arith.constant 0 : i32
    %c0_i32_1 = arith.constant 0 : i32
    return %c0_i32, %c0_i32_0 : i32, i32
  }
  func.func @transform_2(%arg0: i32) -> (i32, i32) {
    %c0_i32 = arith.constant 0 : i32
    %c0_i32_0 = arith.constant 0 : i32
    %c0_i32_1 = arith.constant 0 : i32
    return %c0_i32, %c0_i32_0 : i32, i32
  }
  func.func @transform_3(%arg0: i32) -> (i32, i32) {
    %c0_i32 = arith.constant 0 : i32
    %c0_i32_0 = arith.constant 0 : i32
    %c0_i32_1 = arith.constant 0 : i32
    return %c0_i32, %c0_i32_0 : i32, i32
  }
  func.func @transform_4(%arg0: i32) -> (i32, i32) {
    %c0_i32 = arith.constant 0 : i32
    %c0_i32_0 = arith.constant 0 : i32
    %c0_i32_1 = arith.constant 0 : i32
    return %c0_i32, %c0_i32_0 : i32, i32
  }
  func.func @transform_5(%arg0: i32) -> (i32, i32) {
    %c0_i32 = arith.constant 0 : i32
    %c0_i32_0 = arith.constant 0 : i32
    %c0_i32_1 = arith.constant 0 : i32
    return %c0_i32, %c0_i32_0 : i32, i32
  }
  func.func @transform_6(%arg0: i32) -> (i32, i32) {
    %c0_i32 = arith.constant 0 : i32
    %c0_i32_0 = arith.constant 0 : i32
    %c0_i32_1 = arith.constant 0 : i32
    return %c0_i32, %c0_i32_0 : i32, i32
  }
  func.func @transform_7(%arg0: i32) -> (i32, i32) {
    %c0_i32 = arith.constant 0 : i32
    %c0_i32_0 = arith.constant 0 : i32
    %c0_i32_1 = arith.constant 0 : i32
    return %c0_i32, %c0_i32_0 : i32, i32
  }
  func.func @transform_8(%arg0: i32) -> (i32, i32) {
    %c0_i32 = arith.constant 0 : i32
    %c0_i32_0 = arith.constant 0 : i32
    %c0_i32_1 = arith.constant 0 : i32
    return %c0_i32, %c0_i32_0 : i32, i32
  }
  func.func @transform_9(%arg0: i32) -> (i32, i32) {
    %c0_i32 = arith.constant 0 : i32
    %c0_i32_0 = arith.constant 0 : i32
    return %c0_i32, %arg0 : i32, i32
  }
}

</mosaic_0001>

<bundles_post_ra>
// kernel: tpu_custom_call.1
= control target key start
LH: loop header
LB: loop body
LE: loop exit
PB: predicated region body
PF: predicated region fallthrough
CT: control target
= control target key end

     0   :  { %s844_s0 = inlined_call_operand.vmem [shape: f32[128,23], index: 0, kind: input, shape index: {}]   ;;  %s845_s1 = inlined_call_operand.vmem [shape: f32[16,23], index: 1, kind: input, shape index: {}]   ;;  %s846_s2 = inlined_call_operand.vmem [shape: f32[16,1], index: 2, kind: input, shape index: {}]   ;;  %s847_s3 = inlined_call_operand.vmem [shape: f32[8,16], index: 3, kind: input, shape index: {}]   ;;  %s848_s4 = inlined_call_operand.vmem [shape: f32[8,1], index: 4, kind: input, shape index: {}]   ;;  %s849_s5 = inlined_call_operand.vmem [shape: f32[4,8], index: 5, kind: input, shape index: {}]   ;;  %s850_s6 = inlined_call_operand.vmem [shape: f32[4,1], index: 6, kind: input, shape index: {}]   ;;  %s851_s7 = inlined_call_operand.vmem [shape: f32[1,4], index: 7, kind: input, shape index: {}]   ;;  %s852_s8 = inlined_call_operand.<no memory space> [shape: f32[1,1], index: 8, kind: input, shape index: {}]   ;;  %s853_s9 = inlined_call_operand.hbm [shape: f32[1,128], index: 9, kind: output, shape index: {}]  }
   0x1   :  { %v14_v0 = vstv %s852_s8 }
   0x2   :  { %15 = vst [vmem:[#allocation2] sm:$0x1] %v14_v0 }
   0x3   :  { %v37_v1 = vld [vmem:[%s844_s0] sm:$0xff]  ;;  %v38_v2 = vld [vmem:[%s844_s0 + $0x8] sm:$0xff]  ;;  %vm65_vm0 = vcmask 187392   ;;  %v39_v3 = vld [vmem:[%s844_s0 + $0x10] sm:$0xff]  ;;  %v656_v7 = vmov 0  }
   0x4   :  { %v570_v4 = vpack.c.bf16 %v38_v2, %v37_v1  ;;  %vm725_vm1 = vmpackc.low %vm65_vm0, %vm65_vm0  ;;  %v40_v6 = vld [vmem:[%s844_s0 + $0x18] sm:$0xff]  ;;  %626 = vset.pattern.permute.xlu0 %v656_v7  ;;  %627 = vset.pattern.permute.xlu1 %v656_v7  ;;  %v35_v9 = vld [vmem:[%s845_s1] sm:$0xff] }
   0x5   :  { %v576_v8 = vpack.c.bf16 %v40_v6, %v39_v3  ;;  %v41_v10 = vld [vmem:[%s844_s0 + $0x20] sm:$0xff]  ;;  %v42_v11 = vld [vmem:[%s844_s0 + $0x28] sm:$0xff]  ;;  %550 = vmatprep.mubr.msk.f32.mxu0 %vm65_vm0, %v35_v9 }
   0x6   :  { %572 = vmatprep.subr.msk.bf16.mxu0 %vm725_vm1, %v570_v4  ;;  %v53_v12 = vld [vmem:[%s846_s2] sm:$0xff] }
   0x7   :  { %575 = vmatpush3.bf16.xpose.msk.msra.mxu0 %vm725_vm1, %v570_v4  ;;  %57 = vperm.xlu0 %626, %v53_v12  }
   0x8   :  { %578 = vmatprep.subr.msk.bf16.mxu0 %vm725_vm1, %v576_v8 }
   0x9   :  { %16 = vsyncpa [#allocation4], 0  ;;  %v54_v13 = vld [vmem:[%s846_s2 + $0x8] sm:$0xff]  ;;  %v582_v14 = vpack.c.bf16 %v42_v11, %v41_v10  ;;  %v362_v15 = vld [vmem:[#allocation2] sm:$0x1]  ;;  %v657_v32 = vmov 0.0|0.0   ;;  %v368_v58 = vlaneseq }
   0xa   :  { %v43_v16 = vld [vmem:[%s844_s0 + $0x30] sm:$0xff]  ;;  %v44_v17 = vld [vmem:[%s844_s0 + $0x38] sm:$0xff]  ;;  %v45_v19 = vld [vmem:[%s844_s0 + $0x40] sm:$0xff]  ;;  %618 = vmatprep.subr.bf16.mxu1 %v657_v32  ;;  %vm658_vm2 = vmmov 0   ;;  %v659_v33 = vmov 0.0   ;;  %vm204_vm3 = vcmask 130048  }
   0xb   :  { %62 = vperm.xlu0 %626, %v54_v13   ;;  %v588_v18 = vpack.c.bf16 %v44_v17, %v43_v16  ;;  %v46_v20 = vld [vmem:[%s844_s0 + $0x48] sm:$0xff]  ;;  %v47_v22 = vld [vmem:[%s844_s0 + $0x50] sm:$0xff]  ;;  %v48_v23 = vld [vmem:[%s844_s0 + $0x58] sm:$0xff]  ;;  %557 = vmatprep.mubr.msk.f32.mxu1 %vm658_vm2, %v659_v33  ;;  %vm286_vm4 = vcmask 64512   ;;  %vm376_vm5 = vcmask 1043456   ;;  %vm372_vm6 = vcmask 31744  }
   0xc   :  { %v594_v21 = vpack.c.bf16 %v46_v20, %v45_v19  ;;  %v600_v24 = vpack.c.bf16 %v48_v23, %v47_v22  ;;  %v49_v25 = vld [vmem:[%s844_s0 + $0x60] sm:$0xff]  ;;  %v50_v26 = vld [vmem:[%s844_s0 + $0x68] sm:$0xff]  ;;  %v51_v28 = vld [vmem:[%s844_s0 + $0x70] sm:$0xff]  ;;  %v369_v59 = vshrl.u32 %v368_v58, 7 }
   0xd   :  { %v606_v27 = vpack.c.bf16 %v50_v26, %v49_v25  ;;  %v52_v29 = vld [vmem:[%s844_s0 + $0x78] sm:$0xff]  ;;  %v36_v31 = vld [vmem:[%s845_s1 + $0x8] sm:$0xff]  ;;  %v198_v34 = vld [vmem:[%s848_s4] sm:$0xff] }
   0xe   :  { %v612_v30 = vpack.c.bf16 %v52_v29, %v51_v28  ;;  %201 = vperm.xlu1 %627, %v198_v34   ;;  %v280_v35 = vld [vmem:[%s850_s6] sm:$0xf]  ;;  %v370_v60 = vsub.s32 0, %v369_v59 }
   0xf   :  { %581 = vmatpush3.bf16.xpose.msk.msra.mxu0 %vm725_vm1, %v576_v8  ;;  %365 = vperm.xlu0 %626, %v362_v15   ;;  %v197_v45 = vld [vmem:[%s847_s3] sm:$0xff] }
  0x10   :  { %584 = vmatprep.subr.msk.bf16.mxu0 %vm725_vm1, %v582_v14  ;;  %v279_v51 = vld [vmem:[%s849_s5] sm:$0xf]  ;;  %s660_s5 = smov [#allocation3]  }
  0x11   :  { %v361_v57 = vld [vmem:[%s851_s7] sm:$0x1]  ;;  %s463_s2 = sshll.u32 %s660_s5, 4  ;;  %s464_s2 = int_to_ptr.vmem [resolvable:$true] %s463_s2 }
  0x12   :  { %283 = vperm.xlu1 %627, %v280_v35   ;;  %s632_s7 = scalar_lea.vmem %s464_s2, 16  ;;  %s636_s11 = scalar_lea.vmem %s464_s2, 32 }
  0x13   :  { %p633_p0 = scmp.ne.s32.totalorder %s464_s2, %s632_s7  ;;  %p637_p1 = scmp.lt.s32.totalorder %s464_s2, %s464_s2 }
  0x14   :  { %p638_p2 = scmp.lt.s32.totalorder %s636_s11, %s632_s7 }
  0x16   :  { %p639_p3 = por %p638_p2, %p637_p1 }
  0x17   :  { %587 = vmatpush3.bf16.xpose.msk.msra.mxu0 %vm725_vm1, %v582_v14 }
  0x18   :  { %590 = vmatprep.subr.msk.bf16.mxu0 %vm725_vm1, %v588_v18  ;;  %p640_p4 = pnand %p639_p3, %p633_p0 }
  0x1f   :  { %593 = vmatpush3.bf16.xpose.msk.msra.mxu0 %vm725_vm1, %v588_v18 }
  0x20   :  { %596 = vmatprep.subr.msk.bf16.mxu0 %vm725_vm1, %v594_v21 }
  0x27   :  { %599 = vmatpush3.bf16.xpose.msk.msra.mxu0 %vm725_vm1, %v594_v21 }
  0x28   :  { %602 = vmatprep.subr.msk.bf16.mxu0 %vm725_vm1, %v600_v24 }
  0x2f   :  { %605 = vmatpush3.bf16.xpose.msk.msra.mxu0 %vm725_vm1, %v600_v24 }
  0x30   :  { %608 = vmatprep.subr.msk.bf16.mxu0 %vm725_vm1, %v606_v27 }
  0x37   :  { %611 = vmatpush3.bf16.xpose.msk.msra.mxu0 %vm725_vm1, %v606_v27 }
  0x38   :  { %614 = vmatprep.subr.msk.bf16.mxu0 %vm725_vm1, %v612_v30 }
  0x3f   :  { %617 = vmatpush3.bf16.xpose.msk.msra.mxu0 %vm725_vm1, %v612_v30 }
  0x46   :  { %551 = vmatmul.mubr.msk.f32.vlgmr.msra.gmra.mrb[0].mxu0 %vm65_vm0, %v36_v31 }
  0x86   :  { %v58_v36 = vpop.permute.xlu0 %57 }
  0x8a   :  { %v63_v37 = vpop.permute.xlu0 %62 }
  0x8d   :  { %v202_v46 = vpop.permute.xlu1 %201 }
  0x8e   :  { %v366_v61 = vpop.permute.xlu0 %365 }
  0x8f   :  { %v371_v62 = vrot.slane %v366_v61, %v370_v60 }
  0x91   :  { %v284_v52 = vpop.permute.xlu1 %283 }
 0x119   :  { %v552_v38 = vpop.f32.mrb[0].mxu0 }
 0x11a   :  { %v192_v39 = vadd.f32 %v552_v38, %v63_v37  ;;  %v186_v40 = vpop.f32.mrb[1].mxu0 }
 0x11b   :  { %v187_v41 = vadd.f32 %v186_v40, %v58_v36 }
 0x11c   :  { %v196_v42 = vmax.f32 %v192_v39, 0.0 }
 0x11d   :  { %v195_v43 = vmax.f32 %v187_v41, 0.0 }
 0x11f   :  { %v619_v44 = vpack.c.bf16 %v196_v42, %v195_v43 }
 0x121   :  { %620 = vmatpush3.bf16.msra.mxu1 %v619_v44 }
 0x122   :  { %560 = vmatprep.subr.mxu1 %v659_v33 }
 0x124   :  { %558 = vmatmul.mubr.msk.f32.vlgmr.msra.gmra.mrb[0].mxu1 %vm204_vm3, %v197_v45 }
 0x125   :  { %562 = vmatprep.mubr.msk.f32.mxu1 %vm658_vm2, %v659_v33 }
 0x1f7   :  { %v274_v47 = vpop.f32.mrb[0].mxu1 }
 0x1f8   :  { %v275_v48 = vadd.f32 %v274_v47, %v202_v46  ;;  %v559_v49 = vpop.f32.mrb[1].mxu1 }
 0x1fa   :  { %v278_v50 = vmax.f32 %v275_v48, 0.0 }
 0x1fc   :  { %561 = vmatpush3.msra.mxu1 %v278_v50 }
 0x1fd   :  { %563 = vmatmul.mubr.msk.f32.vlgmr.msra.gmra.mrb[2].mxu1 %vm286_vm4, %v279_v51  ;;  %565 = vmatprep.subr.mxu1 %v659_v33 }
 0x1fe   :  { %567 = vmatprep.mubr.msk.f32.mxu1 %vm658_vm2, %v659_v33 }
 0x2d0   :  { %v356_v53 = vpop.f32.mrb[2].mxu1 }
 0x2d1   :  { %v357_v54 = vadd.f32 %v356_v53, %v284_v52  ;;  %v564_v55 = vpop.f32.mrb[3].mxu1 }
 0x2d3   :  { %v360_v56 = vmax.f32 %v357_v54, 0.0 }
 0x2d5   :  { %566 = vmatpush3.msk.msra.mxu1 %vm376_vm5, %v360_v56 }
 0x2d6   :  { %568 = vmatmul.mubr.msk.f32.vlgmr.msra.gmra.mrb[4].mxu1 %vm372_vm6, %v361_v57 }
 0x3a9   :  { %v446_v63 = vpop.f32.mrb[4].mxu1 }
 0x3aa   :  { %v447_v0 = vadd.f32 %v446_v63, %v371_v62  ;;  %v569_v1 = vpop.f32.mrb[5].mxu1 }
 0x3ac   :  { %v450_v2 = vsub.f32 0.0, %v447_v0 }
 0x3ae   :  { %v451_v3 = vmul.f32 1.442695, %v450_v2 }
 0x3b0   :  { %628 = vpow2.f32 %v451_v3 }
 0x3ba   :  { %v629_v4 = vpop.eup %628 }
 0x3bb   :  { %v453_v5 = vadd.f32 1.0, %v629_v4 }
 0x3bd   :  { %630 = vrcp.f32 %v453_v5 }
 0x3c7   :  { %v631_v6 = vpop.eup %630 }
 0x3c8   :  { %456 = vst [vmem:[#allocation3] sm:$0x1] %v631_v6 }
 0x3c9   :  { %643 = shalt.err (!%p640_p4)
}
 0x3ca   :  { %s644_s14 = scalar_lea.hbm %s853_s9, 16 }
 0x3cb   :  { %p645_p5 = scmp.ne.s32.totalorder %s853_s9, %s644_s14  ;;  %p648_p6 = scmp.lt.u32.totalorder %s644_s14, %s853_s9 }
 0x3cd   :  { %p650_p7 = pnand %p648_p6, %p645_p5 }
 0x3cf   :  { %653 = shalt.err (!%p650_p7)
}
 0x3d0   :  { %466 = dma.vmem_to_hbm [thread:$0]  %s464_s2, 16, %s853_s9, [#allocation4]  }
 0x3d1   :  { %654 = dma.done.wait [#allocation4], 16  }
 0x3d2   :  { %655 = vsyncadd [#allocation4], 4294967280 }
 0x3d3   :  { %470 = vsyncpa [#allocation4], 1 }

</bundles_post_ra>
